<compile_context>
chip_gen: v7x
topology: tpu7x:2x2x1
jax: 0.10.0
libtpu: 0.0.40
codegen_flags: <defaults>
</compile_context>

<pallas_src>
import functools

import jax
import jax.numpy as jnp
from jax.experimental import pallas as pl
from jax.experimental.pallas import tpu as pltpu

_TILE_BYTES = 2 * 1024 * 1024   # per-input-block budget in ACTUAL dtype bytes
_MAX_TILE_ROWS = 2048           # bounds the (tile_b, 1) label block's lane padding


def _round_up(x, m):
    return ((x + m - 1) // m) * m


def _choose_tile_b(batch, feat, itemsize):
    rows = _TILE_BYTES // max(feat * itemsize, 1)
    rows = max(8, (rows // 8) * 8)              # multiple of 8 sublanes
    rows = min(rows, _MAX_TILE_ROWS)
    rows = min(rows, _round_up(batch, 8))       # don't exceed (rounded) batch
    return rows


def _contrastive_kernel(x1_ref, x2_ref, lbl_ref, out_ref, *,
                        margin, scale, batch, tile_b):
    i = pl.program_id(0)                         # batch-tile index ("parallel")

    x1 = x1_ref[...].astype(jnp.float32)         # (tile_b, D)
    x2 = x2_ref[...].astype(jnp.float32)
    lbl = lbl_ref[...]                           # (tile_b, 1) f32 (padded with 0)

    # F.pairwise_distance adds eps=1e-6 to the difference before the norm.
    diff = x1 - x2 + jnp.float32(1e-6)
    d2 = jnp.sum(diff * diff, axis=-1, keepdims=True)          # (tile_b, 1)

    # Similar-pair term straight from d2 (avoids sqrt->square round trip).
    sim = d2 * jnp.float32(scale * scale)
    d = jnp.sqrt(d2) * jnp.float32(scale)
    hinge = jnp.maximum(jnp.float32(margin) - d, 0.0)
    per_sample = (1.0 - lbl) * sim + lbl * (hinge * hinge)      # (tile_b, 1)

    # Mask out-of-range rows of the boundary tile (inputs are NOT padded in HBM)
    # so the mean stays over the true batch size.
    row = jax.lax.broadcasted_iota(jnp.int32, (tile_b, 1), 0)
    global_row = i * tile_b + row
    per_sample = jnp.where(global_row < batch, per_sample, 0.0)

    partial = jnp.sum(per_sample)                # scalar partial for this tile
    out_ref[...] = jnp.full(out_ref.shape, partial, dtype=out_ref.dtype)


def contrastive_loss(output1, output2, label, margin=2.0, normalize=True):
    """Pallas TPU implementation of ContrastiveLoss.forward (scalar f32)."""
    B, D = output1.shape
    scale = (1.0 / float(D)) if normalize else 1.0

    itemsize = jnp.dtype(output1.dtype).itemsize
    tile_b = _choose_tile_b(B, D, itemsize)
    num_tiles = -(-B // tile_b)

    # Pad only the tiny label vector so its (tile_b, 1) blocks are always
    # in-bounds (padded rows are zero; they are masked out anyway).
    lbl = label.reshape(-1).astype(jnp.float32)
    padded_rows = num_tiles * tile_b
    if padded_rows != B:
        lbl = jnp.pad(lbl, (0, padded_rows - B))
    lbl = lbl.reshape(padded_rows, 1)

    kernel = functools.partial(
        _contrastive_kernel,
        margin=float(margin), scale=float(scale), batch=B, tile_b=tile_b,
    )

    partials = pl.pallas_call(
        kernel,
        out_shape=jax.ShapeDtypeStruct((num_tiles, 8, 128), jnp.float32),
        grid=(num_tiles,),
        in_specs=[
            pl.BlockSpec((tile_b, D), lambda i: (i, 0)),   # output1 (native dtype)
            pl.BlockSpec((tile_b, D), lambda i: (i, 0)),   # output2 (native dtype)
            pl.BlockSpec((tile_b, 1), lambda i: (i, 0)),   # label (padded, f32)
        ],
        out_specs=pl.BlockSpec((1, 8, 128), lambda i: (i, 0, 0)),
        compiler_params=pltpu.CompilerParams(
            dimension_semantics=("parallel",),
            vmem_limit_bytes=48 * 1024 * 1024,
        ),
    )(output1, output2, lbl)

    return jnp.sum(partials[:, 0, 0]) / jnp.float32(B)


def _reference(output1, output2, label, margin=2.0, normalize=True):
    # Pure-JAX reference mirroring the PyTorch forward.
    o1 = output1.astype(jnp.float32)
    o2 = output2.astype(jnp.float32)
    d = jnp.sqrt(jnp.sum((o1 - o2 + 1e-6) ** 2, axis=-1))
    if normalize:
        d = d / output1.shape[1]
    lbl = label.astype(jnp.float32)
    return jnp.mean((1.0 - lbl) * d ** 2 + lbl * jnp.maximum(margin - d, 0.0) ** 2)


if __name__ == "__main__":
    key = jax.random.PRNGKey(0)

    # Case 1: small f32 batch, exact tiling (B == tile_b).
    B, D = 8, 32
    k1, k2, k3, k4, k5, k6 = jax.random.split(key, 6)
    o1 = jax.random.normal(k1, (B, D), dtype=jnp.float32)
    o2 = jax.random.normal(k2, (B, D), dtype=jnp.float32)
    lbl = jax.random.bernoulli(k3, p=0.5, shape=(B,)).astype(jnp.float32)

    loss = jax.block_until_ready(contrastive_loss(o1, o2, lbl, margin=2.0, normalize=True))
    ref = _reference(o1, o2, lbl, margin=2.0, normalize=True)
    assert jnp.allclose(loss, ref, rtol=1e-5, atol=1e-5), (loss, ref)

    # Case 2: bf16 inputs, batch not divisible by the tile (boundary-tile mask path,
    # no wrapper-side padding of the big inputs).
    B2, D2 = 37, 96
    o1b = jax.random.normal(k4, (B2, D2), dtype=jnp.bfloat16)
    o2b = jax.random.normal(k5, (B2, D2), dtype=jnp.bfloat16)
    lblb = jax.random.bernoulli(k6, p=0.5, shape=(B2,)).astype(jnp.float32)

    loss2 = jax.block_until_ready(contrastive_loss(o1b, o2b, lblb, margin=2.0, normalize=True))
    ref2 = _reference(o1b, o2b, lblb, margin=2.0, normalize=True)
    assert jnp.allclose(loss2, ref2, rtol=1e-4, atol=1e-5), (loss2, ref2)

    print("KERNEL_OK")
</pallas_src>

<mosaic_0001>
module attributes {stable_mosaic.version = 11 : i64} {
  func.func @_contrastive_kernel(%arg0: i32, %arg1: memref<8x32xf32, #tpu.memory_space<vmem>>, %arg2: memref<8x32xf32, #tpu.memory_space<vmem>>, %arg3: memref<8x1xf32, #tpu.memory_space<vmem>>, %arg4: memref<1x8x128xf32, #tpu.memory_space<vmem>>) attributes {dimension_semantics = [#tpu.dimension_semantics<parallel>], iteration_bounds = array<i64: 1>, scalar_prefetch = 0 : i64, scratch_operands = 0 : i64, tpu.core_type = #tpu.core_type<tc>, window_params = [{transform_indices = @transform_0, window_bounds = array<i64: 8, 32>}, {transform_indices = @transform_1, window_bounds = array<i64: 8, 32>}, {transform_indices = @transform_2, window_bounds = array<i64: 8, 1>}, {transform_indices = @transform_3, window_bounds = array<i64: 1, 8, 128>}]} {
    %c0 = arith.constant 0 : index
    %c0_0 = arith.constant 0 : index
    %0 = vector.load %arg1[%c0, %c0_0] : memref<8x32xf32, #tpu.memory_space<vmem>>, vector<8x32xf32>
    %c0_1 = arith.constant 0 : index
    %c0_2 = arith.constant 0 : index
    %1 = vector.load %arg2[%c0_1, %c0_2] : memref<8x32xf32, #tpu.memory_space<vmem>>, vector<8x32xf32>
    %c0_3 = arith.constant 0 : index
    %c0_4 = arith.constant 0 : index
    %2 = vector.load %arg3[%c0_3, %c0_4] : memref<8x1xf32, #tpu.memory_space<vmem>>, vector<8x1xf32>
    %3 = arith.subf %0, %1 : vector<8x32xf32>
    %cst = arith.constant 9.99999997E-7 : f32
    %4 = vector.broadcast %cst : f32 to vector<8x32xf32>
    %5 = arith.addf %3, %4 : vector<8x32xf32>
    %6 = arith.mulf %5, %5 : vector<8x32xf32>
    %cst_5 = arith.constant dense<0.000000e+00> : vector<8xf32>
    %7 = vector.multi_reduction <add>, %6, %cst_5 [1] : vector<8x32xf32> to vector<8xf32>
    %8 = vector.shape_cast %7 : vector<8xf32> to vector<8x1xf32>
    %cst_6 = arith.constant 9.765625E-4 : f32
    %9 = vector.broadcast %cst_6 : f32 to vector<8x1xf32>
    %10 = arith.mulf %8, %9 : vector<8x1xf32>
    %11 = math.sqrt %8 : vector<8x1xf32>
    %cst_7 = arith.constant 3.125000e-02 : f32
    %12 = vector.broadcast %cst_7 : f32 to vector<8x1xf32>
    %13 = arith.mulf %11, %12 : vector<8x1xf32>
    %cst_8 = arith.constant 2.000000e+00 : f32
    %14 = vector.broadcast %cst_8 : f32 to vector<8x1xf32>
    %15 = arith.subf %14, %13 : vector<8x1xf32>
    %cst_9 = arith.constant 0.000000e+00 : f32
    %16 = vector.broadcast %cst_9 : f32 to vector<8x1xf32>
    %17 = arith.maximumf %15, %16 : vector<8x1xf32>
    %cst_10 = arith.constant 1.000000e+00 : f32
    %18 = vector.broadcast %cst_10 : f32 to vector<8x1xf32>
    %19 = arith.subf %18, %2 : vector<8x1xf32>
    %20 = arith.mulf %19, %10 : vector<8x1xf32>
    %21 = arith.mulf %17, %17 : vector<8x1xf32>
    %22 = arith.mulf %2, %21 : vector<8x1xf32>
    %23 = arith.addf %20, %22 : vector<8x1xf32>
    %24 = tpu.iota {dimensions = array<i32: 0>} : vector<8x1xi32>
    %c8_i32 = arith.constant 8 : i32
    %25 = arith.muli %arg0, %c8_i32 : i32
    %26 = vector.broadcast %25 : i32 to vector<8x1xi32>
    %27 = arith.addi %26, %24 : vector<8x1xi32>
    %c8_i32_11 = arith.constant 8 : i32
    %28 = vector.broadcast %c8_i32_11 : i32 to vector<8x1xi32>
    %29 = arith.cmpi slt, %27, %28 : vector<8x1xi32>
    %cst_12 = arith.constant 0.000000e+00 : f32
    %30 = vector.broadcast %cst_12 : f32 to vector<8x1xf32>
    %31 = arith.select %29, %23, %30 : vector<8x1xi1>, vector<8x1xf32>
    %32 = vector.shape_cast %31 : vector<8x1xf32> to vector<1x8x1xf32>
    %cst_13 = arith.constant dense<0.000000e+00> : vector<1xf32>
    %33 = vector.multi_reduction <add>, %32, %cst_13 [1, 2] : vector<1x8x1xf32> to vector<1xf32>
    %34 = vector.shape_cast %33 : vector<1xf32> to vector<1x1x1xf32>
    %35 = vector.extract %34[0, 0, 0] : f32 from vector<1x1x1xf32>
    %36 = vector.broadcast %35 : f32 to vector<1x8x128xf32>
    %c0_14 = arith.constant 0 : index
    %c0_15 = arith.constant 0 : index
    %c0_16 = arith.constant 0 : index
    %37 = vector.load %arg4[%c0_14, %c0_15, %c0_16] : memref<1x8x128xf32, #tpu.memory_space<vmem>>, vector<1x8x128xf32>
    tpu.vector_store %arg4[%c0_14, %c0_15, %c0_16], %36 {strides = array<i32>} : memref<1x8x128xf32, #tpu.memory_space<vmem>>, vector<1x8x128xf32>,
    return
  }
  func.func @transform_0(%arg0: i32) -> (i32, i32) {
    %c0_i32 = arith.constant 0 : i32
    %c0_i32_0 = arith.constant 0 : i32
    return %arg0, %c0_i32 : i32, i32
  }
  func.func @transform_1(%arg0: i32) -> (i32, i32) {
    %c0_i32 = arith.constant 0 : i32
    %c0_i32_0 = arith.constant 0 : i32
    return %arg0, %c0_i32 : i32, i32
  }
  func.func @transform_2(%arg0: i32) -> (i32, i32) {
    %c0_i32 = arith.constant 0 : i32
    %c0_i32_0 = arith.constant 0 : i32
    return %arg0, %c0_i32 : i32, i32
  }
  func.func @transform_3(%arg0: i32) -> (i32, i32, i32) {
    %c0_i32 = arith.constant 0 : i32
    %c0_i32_0 = arith.constant 0 : i32
    %c0_i32_1 = arith.constant 0 : i32
    return %arg0, %c0_i32, %c0_i32_0 : i32, i32, i32
  }
}

</mosaic_0001>

<bundles_post_ra>
// kernel: tpu_custom_call.1
= control target key start
LH: loop header
LB: loop body
LE: loop exit
PB: predicated region body
PF: predicated region fallthrough
CT: control target
= control target key end

     0   :  { %8 = vsyncpa [#allocation3], 0  ;;  %s194_s0 = inlined_call_operand.vmem [shape: f32[8,32], index: 0, kind: input, shape index: {}]   ;;  %s195_s1 = inlined_call_operand.hbm [shape: f32[8,32], index: 1, kind: input, shape index: {}]   ;;  %s196_s2 = inlined_call_operand.vmem [shape: f32[8,1], index: 2, kind: input, shape index: {}]   ;;  %s197_s3 = inlined_call_operand.hbm [shape: f32[1,8,128], index: 3, kind: output, shape index: {}]  }
   0x1   :  { %9 = vsyncpa [#allocation4], 0  ;;  %s142_s12 = smov [#allocation2]   ;;  %s94_s16 = scalar_lea.hbm %s195_s1, 128 }
   0x2   :  { %s18_s13 = sshll.u32 %s142_s12, 4  ;;  %p95_p0 = scmp.ne.s32.totalorder %s195_s1, %s94_s16  ;;  %s19_s13 = int_to_ptr.vmem [resolvable:$true] %s18_s13 }
   0x3   :  { %p98_p1 = scmp.lt.u32.totalorder %s94_s16, %s195_s1 }
   0x5   :  { %p100_p2 = pnand %p98_p1, %p95_p0 }
   0x7   :  { %103 = shalt.err (!%p100_p2)
}
   0x8   :  { %s104_s21 = scalar_lea.vmem %s19_s13, 128  ;;  %p109_p4 = scmp.lt.s32.totalorder %s19_s13, %s19_s13 }
   0x9   :  { %p105_p3 = scmp.ne.s32.totalorder %s19_s13, %s104_s21  ;;  %p110_p5 = scmp.lt.s32.totalorder %s104_s21, %s104_s21 }
   0xb   :  { %p111_p6 = por %p110_p5, %p109_p4 }
   0xd   :  { %p112_p7 = pnand %p111_p6, %p105_p3 }
   0xf   :  { %115 = shalt.err (!%p112_p7)
}
  0x10   :  { %21 = dma.hbm_to_vmem [thread:$0]  %s195_s1, 128, %s19_s13, [#allocation3]  }
  0x11   :  { %138 = dma.done.wait [#allocation3], 128  }
  0x12   :  { %139 = vsyncadd [#allocation3], 4294967168  ;;  %v27_v0 = vld [vmem:[%s194_s0] sm:$0xff]  ;;  %vm33_vm0 = vcmask 261120   ;;  %vm60_vm3 = vcmask 7168   ;;  %s143_s0 = smov [#allocation5]  }
  0x13   :  { %v28_v1 = vld [vmem:[#allocation2] sm:$0xff] }
  0x14   :  { %v30_v2 = vsub.f32 %v27_v0, %v28_v1  ;;  %v29_v13 = vld [vmem:[%s196_s2] sm:$0xff]  ;;  %s79_s2 = sshll.u32 %s143_s0, 4  ;;  %s80_s2 = int_to_ptr.vmem [resolvable:$true] %s79_s2 }
  0x15   :  { %v48_v17 = vsub.f32 1.0, %v29_v13  ;;  %s116_s28 = scalar_lea.vmem %s80_s2, 128  ;;  %p121_p9 = scmp.lt.s32.totalorder %s80_s2, %s80_s2 }
  0x16   :  { %v31_v3 = vadd.f32 1e-06, %v30_v2  ;;  %p117_p8 = scmp.ne.s32.totalorder %s80_s2, %s116_s28  ;;  %p122_p10 = scmp.lt.s32.totalorder %s116_s28, %s116_s28 }
  0x18   :  { %v32_v4 = vmul.f32 %v31_v3, %v31_v3  ;;  %p123_p11 = por %p122_p10, %p121_p9 }
  0x1a   :  { %v34_v5 = vsel %vm33_vm0, %v32_v4, 0.0  ;;  %p124_p12 = pnand %p123_p11, %p117_p8 }
  0x1b   :  { %35 = vadd.xlane.f32.xlu0 %v34_v5 }
  0xa8   :  { %v36_v6 = vpop.xlane.xlu0 %35 }
  0xa9   :  { %92 = vrsqrt.f32 %v36_v6  ;;  %vm40_vm1 = vcmp.eq.f32.partialorder %v36_v6, inf  ;;  %v43_v9 = vand.u32 2147483648, %v36_v6  ;;  %vm42_vm2 = vcmp.eq.f32.partialorder %v36_v6, 0.0 }
  0xaa   :  { %v37_v15 = vmul.f32 0.0009765625, %v36_v6 }
  0xac   :  { %v49_v19 = vmul.f32 %v48_v17, %v37_v15 }
  0xb3   :  { %v93_v7 = vpop.eup %92 }
  0xb4   :  { %v39_v8 = vmul.f32 %v93_v7, %v36_v6 }
  0xb6   :  { %v41_v10 = vsel %vm40_vm1, %v36_v6, %v39_v8 }
  0xb7   :  { %v44_v11 = vsel %vm42_vm2, %v43_v9, %v41_v10 }
  0xb8   :  { %v45_v12 = vmul.f32 0.03125, %v44_v11 }
  0xba   :  { %v46_v14 = vsub.f32 2.0, %v45_v12 }
  0xbc   :  { %v47_v16 = vmax.f32 %v46_v14, 0.0 }
  0xbe   :  { %v50_v18 = vmul.f32 %v47_v16, %v47_v16 }
  0xc0   :  { %v51_v20 = vmul.f32 %v50_v18, %v29_v13 }
  0xc2   :  { %v52_v21 = vadd.f32 %v51_v20, %v49_v19 }
  0xc4   :  { %v61_v22 = vsel %vm60_vm3, %v52_v21, 0.0 }
  0xc5   :  { %62 = vadd.xlane.f32.xlu0 %v61_v22 }
 0x152   :  { %v63_v23 = vpop.xlane.xlu0 %62 }
 0x153   :  { %v64_v24 = vrot.slane %v63_v23, 4 }
 0x155   :  { %v65_v25 = vadd.f32 %v64_v24, %v63_v23 }
 0x157   :  { %v66_v26 = vrot.slane %v65_v25, 2 }
 0x159   :  { %v67_v27 = vadd.f32 %v66_v26, %v65_v25 }
 0x15b   :  { %v68_v28 = vrot.slane %v67_v27, 1 }
 0x15d   :  { %v69_v29 = vadd.f32 %v68_v28, %v67_v27 }
 0x15f   :  { %88 = vpush %v69_v29 }
 0x190   :  { %s89_s27 = spop %88 }
 0x191   :  { %v71_v30 = vstv %s89_s27 }
 0x192   :  { %72 = vst [vmem:[#allocation5] sm:$0xff] %v71_v30 }
 0x193   :  { %127 = shalt.err (!%p124_p12)
}
 0x194   :  { %s128_s4 = scalar_lea.hbm %s197_s3, 128 }
 0x195   :  { %p129_p13 = scmp.ne.s32.totalorder %s197_s3, %s128_s4  ;;  %p132_p0 = scmp.lt.u32.totalorder %s128_s4, %s197_s3 }
 0x197   :  { %p134_p1 = pnand %p132_p0, %p129_p13 }
 0x199   :  { %137 = shalt.err (!%p134_p1)
}
 0x19a   :  { %82 = dma.vmem_to_hbm [thread:$0]  %s80_s2, 128, %s197_s3, [#allocation4]  }
 0x19b   :  { %140 = dma.done.wait [#allocation4], 128  }
 0x19c   :  { %141 = vsyncadd [#allocation4], 4294967168 }
 0x19d   :  { %86 = vsyncpa [#allocation3], 1 }
 0x19e   :  { %87 = vsyncpa [#allocation4], 1 }

</bundles_post_ra>
